<compile_context>
chip_gen: v6e
topology: v6e:2x2x1
jax: 0.10.0
libtpu: 0.0.40
codegen_flags: <defaults>
</compile_context>

<pallas_src>
import functools

import jax
import jax.numpy as jnp
from jax.experimental import pallas as pl
from jax.experimental.pallas import tpu as pltpu


def _lns_kernel(x_ref, w_ref, b_ref, o_ref, *, eps, inv_c):
    # x_ref/o_ref: (TB, C, TL, 128) [dense path] or (TB, C, THW) [fallback path].
    # w_ref/b_ref: (1, C, 1, 128) or (1, C, 1) — broadcast against the block.
    x = x_ref[...].astype(jnp.float32)
    u = jnp.sum(x, axis=1, keepdims=True) * inv_c          # channel mean
    d = x - u
    s = jnp.sum(d * d, axis=1, keepdims=True) * inv_c      # biased channel variance
    inv = jax.lax.rsqrt(s + eps)                           # EUP rsqrt
    w = w_ref[...].astype(jnp.float32)
    b = b_ref[...].astype(jnp.float32)
    o_ref[...] = (d * inv * w + b).astype(o_ref.dtype)


def _dense_tiles(B, C, NL, elem_bytes, target_bytes):
    """Pick (TB, TL) for blocks of shape (TB, C, TL, 128) close to target_bytes."""
    row_bytes = C * 128 * elem_bytes                  # one 128-wide spatial row, all channels
    rows_target = max(1, target_bytes // row_bytes)
    if rows_target >= NL:
        tl = NL                                       # whole spatial extent per batch element
        tb = min(B, max(1, rows_target // NL))        # fold batch in when HW is small
    else:
        tb = 1
        tl = min(NL, max(8, (rows_target // 8) * 8))  # sublane tile: multiple of 8 (or full)
    return tb, tl


def layer_norm_sec_dim(x_nchw, weight, bias, eps=1e-6, target_block_bytes=2 << 20):
    """x_nchw: (B, C, H, W); weight, bias: (C,). Returns (B, C, H, W)."""
    B, C, H, W = x_nchw.shape
    HW = H * W
    elem_bytes = jnp.dtype(x_nchw.dtype).itemsize

    if HW % 128 == 0:
        # Dense layout: (B, C, NL, 128). Sublane axis is spatial -> fully occupied vregs.
        NL = HW // 128
        x_in = x_nchw.reshape(B, C, NL, 128)
        tb, tl = _dense_tiles(B, C, NL, elem_bytes, target_block_bytes)
        grid = (pl.cdiv(B, tb), pl.cdiv(NL, tl))
        x_block = (tb, C, tl, 128)
        x_idx = lambda bi, si: (bi, 0, si, 0)
        # Pre-tile weight/bias across lanes (tiny) so the in-kernel broadcast is only over
        # batch/sublanes; constant index_map keeps them resident (no per-step DMA).
        w_in = jnp.broadcast_to(weight.reshape(1, C, 1, 1), (1, C, 1, 128))
        b_in = jnp.broadcast_to(bias.reshape(1, C, 1, 1), (1, C, 1, 128))
        wb_block = (1, C, 1, 128)
        wb_idx = lambda bi, si: (0, 0, 0, 0)
    else:
        # Fallback: (B, C, HW), channel reduction on the sublane axis.  Still no padding:
        # last-dim-full blocks (or 128-multiple tiles with a masked ragged tail).
        x_in = x_nchw.reshape(B, C, HW)
        rows = pl.cdiv(HW, 128)
        row_bytes = C * 128 * elem_bytes
        rows_target = max(1, target_block_bytes // row_bytes)
        if rows_target >= rows:
            thw = HW                                  # full last dim (any size allowed)
            tb = min(B, max(1, rows_target // rows))
            n_spatial = 1
        else:
            thw = rows_target * 128                   # lane tile: multiple of 128
            tb = 1
            n_spatial = pl.cdiv(HW, thw)
        grid = (pl.cdiv(B, tb), n_spatial)
        x_block = (tb, C, thw)
        x_idx = lambda bi, si: (bi, 0, si)
        w_in = weight.reshape(1, C, 1)
        b_in = bias.reshape(1, C, 1)
        wb_block = (1, C, 1)
        wb_idx = lambda bi, si: (0, 0, 0)

    kernel = functools.partial(_lns_kernel, eps=float(eps), inv_c=1.0 / C)

    out = pl.pallas_call(
        kernel,
        out_shape=jax.ShapeDtypeStruct(x_in.shape, x_nchw.dtype),
        grid_spec=pltpu.PrefetchScalarGridSpec(
            num_scalar_prefetch=0,
            grid=grid,
            in_specs=[
                pl.BlockSpec(x_block, x_idx),
                pl.BlockSpec(wb_block, wb_idx),
                pl.BlockSpec(wb_block, wb_idx),
            ],
            out_specs=pl.BlockSpec(x_block, x_idx),
        ),
        compiler_params=pltpu.CompilerParams(
            dimension_semantics=("parallel", "parallel"),
            vmem_limit_bytes=32 * 1024 * 1024,
        ),
    )(x_in, w_in, b_in)

    return out.reshape(B, C, H, W)


def _reference(x, weight, bias, eps=1e-6):
    # Pure-JAX reference mirroring the PyTorch forward (NCHW, reduce over dim 1).
    u = jnp.mean(x, axis=1, keepdims=True)
    s = jnp.mean((x - u) ** 2, axis=1, keepdims=True)
    xn = (x - u) / jnp.sqrt(s + eps)
    return weight[None, :, None, None] * xn + bias[None, :, None, None]


if __name__ == "__main__":
    key = jax.random.PRNGKey(0)
    B, C, H, W = 2, 4, 16, 16   # hidden_size = C = 4
    x = jax.random.normal(key, (B, C, H, W), dtype=jnp.float32)

    # Deterministic, slightly non-trivial affine params.
    weight = 1.0 + 0.1 * jnp.arange(C, dtype=jnp.float32)
    bias = 0.05 * jnp.arange(C, dtype=jnp.float32)

    # Main (dense, HW % 128 == 0) path.
    out = layer_norm_sec_dim(x, weight, bias, eps=1e-6)
    out = jax.block_until_ready(out)
    ref = _reference(x, weight, bias, eps=1e-6)
    assert out.shape == (B, C, H, W)
    assert jnp.max(jnp.abs(out - ref)) < 1e-4

    # Also exercise the non-multiple-of-128 fallback path once (no padding, full-dim block).
    x2 = jax.random.normal(jax.random.PRNGKey(1), (2, C, 14, 14), dtype=jnp.float32)
    out2 = jax.block_until_ready(layer_norm_sec_dim(x2, weight, bias, eps=1e-6))
    ref2 = _reference(x2, weight, bias, eps=1e-6)
    assert jnp.max(jnp.abs(out2 - ref2)) < 1e-4

    print("KERNEL_OK")
</pallas_src>

<mosaic_0001>
module attributes {stable_mosaic.version = 11 : i64} {
  func.func @_lns_kernel(%arg0: i32, %arg1: i32, %arg2: memref<2x4x2x128xf32, #tpu.memory_space<vmem>>, %arg3: memref<1x4x1x128xf32, #tpu.memory_space<vmem>>, %arg4: memref<1x4x1x128xf32, #tpu.memory_space<vmem>>, %arg5: memref<2x4x2x128xf32, #tpu.memory_space<vmem>>) attributes {dimension_semantics = [#tpu.dimension_semantics<parallel>, #tpu.dimension_semantics<parallel>], iteration_bounds = array<i64: 1, 1>, scalar_prefetch = 0 : i64, scratch_operands = 0 : i64, tpu.core_type = #tpu.core_type<tc>, window_params = [{transform_indices = @transform_0, window_bounds = array<i64: 2, 4, 2, 128>}, {pipeline_mode = #tpu.pipeline_mode<synchronous>, transform_indices = @transform_1, window_bounds = array<i64: 1, 4, 1, 128>}, {pipeline_mode = #tpu.pipeline_mode<synchronous>, transform_indices = @transform_2, window_bounds = array<i64: 1, 4, 1, 128>}, {transform_indices = @transform_3, window_bounds = array<i64: 2, 4, 2, 128>}]} {
    %c0 = arith.constant 0 : index
    %c0_0 = arith.constant 0 : index
    %c0_1 = arith.constant 0 : index
    %c0_2 = arith.constant 0 : index
    %0 = vector.load %arg2[%c0, %c0_0, %c0_1, %c0_2] : memref<2x4x2x128xf32, #tpu.memory_space<vmem>>, vector<2x4x2x128xf32>
    %cst = arith.constant dense<0.000000e+00> : vector<2x2x128xf32>
    %1 = vector.multi_reduction <add>, %0, %cst [1] : vector<2x4x2x128xf32> to vector<2x2x128xf32>
    %2 = vector.shape_cast %1 : vector<2x2x128xf32> to vector<2x1x2x128xf32>
    %cst_3 = arith.constant 2.500000e-01 : f32
    %3 = vector.broadcast %cst_3 : f32 to vector<2x1x2x128xf32>
    %4 = arith.mulf %2, %3 : vector<2x1x2x128xf32>
    %5 = vector.broadcast %4 : vector<2x1x2x128xf32> to vector<2x4x2x128xf32>
    %6 = arith.subf %0, %5 : vector<2x4x2x128xf32>
    %7 = arith.mulf %6, %6 : vector<2x4x2x128xf32>
    %cst_4 = arith.constant dense<0.000000e+00> : vector<2x2x128xf32>
    %8 = vector.multi_reduction <add>, %7, %cst_4 [1] : vector<2x4x2x128xf32> to vector<2x2x128xf32>
    %9 = vector.shape_cast %8 : vector<2x2x128xf32> to vector<2x1x2x128xf32>
    %cst_5 = arith.constant 2.500000e-01 : f32
    %10 = vector.broadcast %cst_5 : f32 to vector<2x1x2x128xf32>
    %11 = arith.mulf %9, %10 : vector<2x1x2x128xf32>
    %cst_6 = arith.constant 9.99999997E-7 : f32
    %12 = vector.broadcast %cst_6 : f32 to vector<2x1x2x128xf32>
    %13 = arith.addf %11, %12 : vector<2x1x2x128xf32>
    %14 = math.rsqrt %13 : vector<2x1x2x128xf32>
    %c0_7 = arith.constant 0 : index
    %c0_8 = arith.constant 0 : index
    %c0_9 = arith.constant 0 : index
    %c0_10 = arith.constant 0 : index
    %15 = vector.load %arg3[%c0_7, %c0_8, %c0_9, %c0_10] : memref<1x4x1x128xf32, #tpu.memory_space<vmem>>, vector<1x4x1x128xf32>
    %c0_11 = arith.constant 0 : index
    %c0_12 = arith.constant 0 : index
    %c0_13 = arith.constant 0 : index
    %c0_14 = arith.constant 0 : index
    %16 = vector.load %arg4[%c0_11, %c0_12, %c0_13, %c0_14] : memref<1x4x1x128xf32, #tpu.memory_space<vmem>>, vector<1x4x1x128xf32>
    %17 = vector.broadcast %14 : vector<2x1x2x128xf32> to vector<2x4x2x128xf32>
    %18 = arith.mulf %6, %17 : vector<2x4x2x128xf32>
    %19 = vector.broadcast %15 : vector<1x4x1x128xf32> to vector<2x4x2x128xf32>
    %20 = arith.mulf %18, %19 : vector<2x4x2x128xf32>
    %21 = vector.broadcast %16 : vector<1x4x1x128xf32> to vector<2x4x2x128xf32>
    %22 = arith.addf %20, %21 : vector<2x4x2x128xf32>
    %c0_15 = arith.constant 0 : index
    %c0_16 = arith.constant 0 : index
    %c0_17 = arith.constant 0 : index
    %c0_18 = arith.constant 0 : index
    %23 = vector.load %arg5[%c0_15, %c0_16, %c0_17, %c0_18] : memref<2x4x2x128xf32, #tpu.memory_space<vmem>>, vector<2x4x2x128xf32>
    tpu.vector_store %arg5[%c0_15, %c0_16, %c0_17, %c0_18], %22 {strides = array<i32>} : memref<2x4x2x128xf32, #tpu.memory_space<vmem>>, vector<2x4x2x128xf32>,
    return
  }
  func.func @transform_0(%arg0: i32, %arg1: i32) -> (i32, i32, i32, i32) {
    %c0_i32 = arith.constant 0 : i32
    %c0_i32_0 = arith.constant 0 : i32
    %c0_i32_1 = arith.constant 0 : i32
    return %arg0, %c0_i32, %arg1, %c0_i32_0 : i32, i32, i32, i32
  }
  func.func @transform_1(%arg0: i32, %arg1: i32) -> (i32, i32, i32, i32) {
    %c0_i32 = arith.constant 0 : i32
    %c0_i32_0 = arith.constant 0 : i32
    %c0_i32_1 = arith.constant 0 : i32
    %c0_i32_2 = arith.constant 0 : i32
    %c0_i32_3 = arith.constant 0 : i32
    return %c0_i32, %c0_i32_0, %c0_i32_1, %c0_i32_2 : i32, i32, i32, i32
  }
  func.func @transform_2(%arg0: i32, %arg1: i32) -> (i32, i32, i32, i32) {
    %c0_i32 = arith.constant 0 : i32
    %c0_i32_0 = arith.constant 0 : i32
    %c0_i32_1 = arith.constant 0 : i32
    %c0_i32_2 = arith.constant 0 : i32
    %c0_i32_3 = arith.constant 0 : i32
    return %c0_i32, %c0_i32_0, %c0_i32_1, %c0_i32_2 : i32, i32, i32, i32
  }
  func.func @transform_3(%arg0: i32, %arg1: i32) -> (i32, i32, i32, i32) {
    %c0_i32 = arith.constant 0 : i32
    %c0_i32_0 = arith.constant 0 : i32
    %c0_i32_1 = arith.constant 0 : i32
    return %arg0, %c0_i32, %arg1, %c0_i32_0 : i32, i32, i32, i32
  }
}

</mosaic_0001>

<bundles_post_ra>
// kernel: tpu_custom_call.1
= control target key start
LH: loop header
LB: loop body
LE: loop exit
PB: predicated region body
PF: predicated region fallthrough
CT: control target
= control target key end

     0   :  { %8 = vsyncpa [#allocation3], 0  ;;  %s391_s0 = inlined_call_operand.hbm [shape: f32[2,4,2,128], index: 0, kind: input, shape index: {}]   ;;  %s392_s1 = inlined_call_operand.hbm [shape: f32[1,4,1,128], index: 1, kind: input, shape index: {}]   ;;  %s393_s2 = inlined_call_operand.hbm [shape: f32[1,4,1,128], index: 2, kind: input, shape index: {}]   ;;  %s394_s3 = inlined_call_operand.hbm [shape: f32[2,4,2,128], index: 3, kind: output, shape index: {}]  }
   0x1   :  { %9 = vsyncpa [#allocation6], 0 }
   0x2   :  { %10 = vsyncpa [#allocation4], 0  ;;  %s329_s12 = smov [#allocation5]  }
   0x3   :  { %s28_s13 = sshll.u32 %s329_s12, 4  ;;  %s29_s13 = int_to_ptr.vmem [resolvable:$true] %s28_s13 }
   0x4   :  { %s251_s14 = scalar_lea.vmem %s29_s13, 64  ;;  %p256_p1 = scmp.lt.s32.totalorder %s29_s13, %s29_s13 }
   0x5   :  { %p252_p0 = scmp.ne.s32.totalorder %s29_s13, %s251_s14  ;;  %p257_p2 = scmp.lt.s32.totalorder %s251_s14, %s251_s14 }
   0x7   :  { %p258_p3 = por %p257_p2, %p256_p1 }
   0x9   :  { %p259_p4 = pnand %p258_p3, %p252_p0 }
   0xb   :  { %262 = shalt.err (!%p259_p4)
}
   0xc   :  { %s330_s15 = smov 16   ;;  %s331_s16 = smov 1  }
   0xd   :  { %34 = dma.hbm_to_vmem [thread:$0]  %s392_s1, 64, %s29_s13, [#allocation6], %s330_s15, %s330_s15, %s331_s16  }
   0xe   :  { %s332_s19 = smov [#allocation2]  }
   0xf   :  { %s16_s20 = sshll.u32 %s332_s19, 4  ;;  %s17_s20 = int_to_ptr.vmem [resolvable:$true] %s16_s20 }
  0x10   :  { %s271_s21 = scalar_lea.vmem %s17_s20, 256  ;;  %p276_p6 = scmp.lt.s32.totalorder %s17_s20, %s17_s20 }
  0x11   :  { %p272_p5 = scmp.ne.s32.totalorder %s17_s20, %s271_s21  ;;  %p277_p7 = scmp.lt.s32.totalorder %s271_s21, %s271_s21 }
  0x13   :  { %p278_p8 = por %p277_p7, %p276_p6 }
  0x15   :  { %p279_p9 = pnand %p278_p8, %p272_p5 }
  0x17   :  { %282 = shalt.err (!%p279_p9)
}
  0x18   :  { %s333_s22 = smov 32   ;;  %s334_s23 = smov 2  }
  0x19   :  { %22 = dma.hbm_to_vmem [thread:$0]  %s391_s0, 256, %s17_s20, [#allocation3], %s333_s22, %s333_s22, %s334_s23  }
  0x1a   :  { %s335_s1 = smov [#allocation7]  }
  0x1b   :  { %s40_s26 = sshll.u32 %s335_s1, 4  ;;  %s41_s26 = int_to_ptr.vmem [resolvable:$true] %s40_s26 }
  0x1c   :  { %s291_s27 = scalar_lea.vmem %s41_s26, 64  ;;  %p296_p11 = scmp.lt.s32.totalorder %s41_s26, %s41_s26 }
  0x1d   :  { %p292_p10 = scmp.ne.s32.totalorder %s41_s26, %s291_s27  ;;  %p297_p12 = scmp.lt.s32.totalorder %s291_s27, %s291_s27 }
  0x1f   :  { %p298_p13 = por %p297_p12, %p296_p11 }
  0x21   :  { %p299_p0 = pnand %p298_p13, %p292_p10 }
  0x23   :  { %302 = shalt.err (!%p299_p0)
}
  0x24   :  { %46 = dma.hbm_to_vmem [thread:$0]  %s393_s2, 64, %s41_s26, [#allocation6], %s330_s15, %s330_s15, %s331_s16  }
  0x25   :  { %323 = dma.done.wait [#allocation3], 256  }
  0x26   :  { %324 = vsyncadd [#allocation3], 4294967040 }
  0x27   :  { %325 = dma.done.wait [#allocation6], 128  }
  0x28   :  { %326 = vsyncadd [#allocation6], 4294967168  ;;  %vm64_vm0 = vcmask 1041408   ;;  %v56_v0 = vld [vmem:[#allocation2] sm:$0x3]  ;;  %s336_s0 = smov [#allocation8]  }
  0x29   :  { %v57_v1 = vld [vmem:[#allocation2 + $0x2] sm:$0x3]  ;;  %v58_v2 = vld [vmem:[#allocation2 + $0x4] sm:$0x3]  ;;  %v59_v3 = vld [vmem:[#allocation2 + $0x6] sm:$0x3] }
  0x2a   :  { %v65_v4 = vsel %vm64_vm0, %v56_v0, 0.0  ;;  %v66_v5 = vsel %vm64_vm0, %v57_v1, 0.0  ;;  %v68_v6 = vsel %vm64_vm0, %v58_v2, 0.0  ;;  %v70_v8 = vsel %vm64_vm0, %v59_v3, 0.0  ;;  %v60_v10 = vld [vmem:[#allocation2 + $0x8] sm:$0x3] }
  0x2b   :  { %v67_v7 = vadd.f32 %v66_v5, %v65_v4  ;;  %v61_v11 = vld [vmem:[#allocation2 + $0xa] sm:$0x3]  ;;  %v62_v12 = vld [vmem:[#allocation2 + $0xc] sm:$0x3]  ;;  %v63_v14 = vld [vmem:[#allocation2 + $0xe] sm:$0x3] }
  0x2c   :  { %v72_v15 = vsel %vm64_vm0, %v60_v10, 0.0  ;;  %v73_v16 = vsel %vm64_vm0, %v61_v11, 0.0  ;;  %v75_v17 = vsel %vm64_vm0, %v62_v12, 0.0  ;;  %v77_v20 = vsel %vm64_vm0, %v63_v14, 0.0  ;;  %v223_v58 = vld [vmem:[#allocation5] ss:$0 sm:$0xff] }
  0x2d   :  { %v69_v9 = vadd.f32 %v68_v6, %v67_v7  ;;  %v74_v18 = vadd.f32 %v73_v16, %v72_v15  ;;  %v224_v60 = vld [vmem:[#allocation5 + $0x1] ss:$0 sm:$0xff]  ;;  %v225_v61 = vld [vmem:[#allocation5 + $0x2] ss:$0 sm:$0xff]  ;;  %v226_v62 = vld [vmem:[#allocation5 + $0x3] ss:$0 sm:$0xff] }
  0x2e   :  { %v227_v63 = vld [vmem:[#allocation7] ss:$0 sm:$0xff]  ;;  %v228_v4 = vld [vmem:[#allocation7 + $0x1] ss:$0 sm:$0xff]  ;;  %v229_v5 = vld [vmem:[#allocation7 + $0x2] ss:$0 sm:$0xff] }
  0x2f   :  { %v71_v13 = vadd.f32 %v70_v8, %v69_v9  ;;  %v76_v21 = vadd.f32 %v75_v17, %v74_v18  ;;  %v230_v6 = vld [vmem:[#allocation7 + $0x3] ss:$0 sm:$0xff]  ;;  %s210_s2 = sshll.u32 %s336_s0, 4  ;;  %s211_s2 = int_to_ptr.vmem [resolvable:$true] %s210_s2 }
  0x30   :  { %s303_s30 = scalar_lea.vmem %s211_s2, 256  ;;  %p308_p2 = scmp.lt.s32.totalorder %s211_s2, %s211_s2 }
  0x31   :  { %v79_v19 = vmul.f32 0.25, %v71_v13  ;;  %v78_v26 = vadd.f32 %v77_v20, %v76_v21  ;;  %p304_p1 = scmp.ne.s32.totalorder %s211_s2, %s303_s30  ;;  %p309_p3 = scmp.lt.s32.totalorder %s303_s30, %s303_s30 }
  0x33   :  { %v81_v22 = vsub.f32 %v56_v0, %v79_v19  ;;  %v82_v23 = vsub.f32 %v57_v1, %v79_v19  ;;  %v83_v24 = vsub.f32 %v58_v2, %v79_v19  ;;  %v84_v25 = vsub.f32 %v59_v3, %v79_v19  ;;  %p310_p4 = por %p309_p3, %p308_p2 }
  0x34   :  { %v80_v31 = vmul.f32 0.25, %v78_v26 }
  0x35   :  { %v89_v27 = vmul.f32 %v81_v22, %v81_v22  ;;  %v90_v28 = vmul.f32 %v82_v23, %v82_v23  ;;  %v91_v29 = vmul.f32 %v83_v24, %v83_v24  ;;  %v92_v30 = vmul.f32 %v84_v25, %v84_v25  ;;  %p311_p5 = pnand %p310_p4, %p304_p1 }
  0x36   :  { %v85_v36 = vsub.f32 %v60_v10, %v80_v31  ;;  %v86_v37 = vsub.f32 %v61_v11, %v80_v31  ;;  %v87_v38 = vsub.f32 %v62_v12, %v80_v31  ;;  %v88_v40 = vsub.f32 %v63_v14, %v80_v31 }
  0x37   :  { %v97_v32 = vsel %vm64_vm0, %v89_v27, 0.0  ;;  %v98_v33 = vsel %vm64_vm0, %v90_v28, 0.0  ;;  %v100_v34 = vsel %vm64_vm0, %v91_v29, 0.0  ;;  %v102_v39 = vsel %vm64_vm0, %v92_v30, 0.0 }
  0x38   :  { %v99_v35 = vadd.f32 %v98_v33, %v97_v32  ;;  %v93_v42 = vmul.f32 %v85_v36, %v85_v36  ;;  %v94_v43 = vmul.f32 %v86_v37, %v86_v37  ;;  %v95_v44 = vmul.f32 %v87_v38, %v87_v38 }
  0x39   :  { %v96_v45 = vmul.f32 %v88_v40, %v88_v40 }
  0x3a   :  { %v101_v41 = vadd.f32 %v100_v34, %v99_v35  ;;  %v104_v47 = vsel %vm64_vm0, %v93_v42, 0.0  ;;  %v105_v48 = vsel %vm64_vm0, %v94_v43, 0.0  ;;  %v107_v49 = vsel %vm64_vm0, %v95_v44, 0.0 }
  0x3b   :  { %v106_v50 = vadd.f32 %v105_v48, %v104_v47  ;;  %v109_v52 = vsel %vm64_vm0, %v96_v45, 0.0 }
  0x3c   :  { %v103_v46 = vadd.f32 %v102_v39, %v101_v41 }
  0x3d   :  { %v108_v53 = vadd.f32 %v107_v49, %v106_v50 }
  0x3e   :  { %v111_v51 = vmul.f32 0.25, %v103_v46 }
  0x3f   :  { %v110_v55 = vadd.f32 %v109_v52, %v108_v53 }
  0x40   :  { %v113_v54 = vadd.f32 1e-06, %v111_v51 }
  0x41   :  { %v112_v56 = vmul.f32 0.25, %v110_v55 }
  0x42   :  { %239 = vrsqrt.f32 %v113_v54 }
  0x43   :  { %v114_v57 = vadd.f32 1e-06, %v112_v56 }
  0x45   :  { %241 = vrsqrt.f32 %v114_v57 }
  0x4f   :  { %v240_v59 = vpop.eup %239 }
  0x50   :  { %v125_v0 = vmul.f32 %v240_v59, %v81_v22  ;;  %v126_v1 = vmul.f32 %v240_v59, %v82_v23  ;;  %v127_v2 = vmul.f32 %v240_v59, %v83_v24  ;;  %v128_v3 = vmul.f32 %v240_v59, %v84_v25 }
  0x52   :  { %v157_v7 = vmul.f32 %v223_v58, %v125_v0  ;;  %v158_v8 = vmul.f32 %v224_v60, %v126_v1  ;;  %v159_v9 = vmul.f32 %v225_v61, %v127_v2  ;;  %v160_v10 = vmul.f32 %v226_v62, %v128_v3  ;;  %v242_v11 = vpop.eup %241 }
  0x53   :  { %v129_v16 = vmul.f32 %v242_v11, %v85_v36  ;;  %v130_v17 = vmul.f32 %v242_v11, %v86_v37  ;;  %v131_v18 = vmul.f32 %v242_v11, %v87_v38  ;;  %v132_v19 = vmul.f32 %v242_v11, %v88_v40 }
  0x54   :  { %v189_v12 = vadd.f32 %v227_v63, %v157_v7  ;;  %v190_v13 = vadd.f32 %v228_v4, %v158_v8  ;;  %v191_v14 = vadd.f32 %v229_v5, %v159_v9  ;;  %v192_v15 = vadd.f32 %v230_v6, %v160_v10 }
  0x55   :  { %v161_v20 = vmul.f32 %v223_v58, %v129_v16  ;;  %v162_v21 = vmul.f32 %v224_v60, %v130_v17  ;;  %v163_v22 = vmul.f32 %v225_v61, %v131_v18  ;;  %v164_v23 = vmul.f32 %v226_v62, %v132_v19 }
  0x56   :  { %197 = vst [vmem:[#allocation8] sm:$0x3] %v189_v12  ;;  %198 = vst [vmem:[#allocation8 + $0x2] sm:$0x3] %v190_v13 }
  0x57   :  { %199 = vst [vmem:[#allocation8 + $0x4] sm:$0x3] %v191_v14  ;;  %200 = vst [vmem:[#allocation8 + $0x6] sm:$0x3] %v192_v15  ;;  %v193_v24 = vadd.f32 %v227_v63, %v161_v20  ;;  %v194_v25 = vadd.f32 %v228_v4, %v162_v21  ;;  %v195_v26 = vadd.f32 %v229_v5, %v163_v22 }
  0x58   :  { %v196_v27 = vadd.f32 %v230_v6, %v164_v23 }
  0x59   :  { %201 = vst [vmem:[#allocation8 + $0x8] sm:$0x3] %v193_v24  ;;  %202 = vst [vmem:[#allocation8 + $0xa] sm:$0x3] %v194_v25 }
  0x5a   :  { %203 = vst [vmem:[#allocation8 + $0xc] sm:$0x3] %v195_v26  ;;  %204 = vst [vmem:[#allocation8 + $0xe] sm:$0x3] %v196_v27 }
  0x5b   :  { %314 = shalt.err (!%p311_p5)
}
  0x5c   :  { %216 = dma.vmem_to_hbm [thread:$0]  %s211_s2, 256, %s394_s3, [#allocation4], %s333_s22, %s333_s22, %s334_s23  }
  0x5d   :  { %327 = dma.done.wait [#allocation4], 256  }
  0x5e   :  { %328 = vsyncadd [#allocation4], 4294967040 }
  0x5f   :  { %220 = vsyncpa [#allocation3], 1 }
  0x60   :  { %221 = vsyncpa [#allocation6], 1 }
  0x61   :  { %222 = vsyncpa [#allocation4], 1 }

</bundles_post_ra>
